<compile_context>
chip_gen: v7x
topology: tpu7x:2x2x1
jax: 0.10.0
libtpu: 0.0.40
codegen_flags: <defaults>
</compile_context>

<pallas_src>
import math

import jax
import jax.numpy as jnp
from jax import lax
from jax.experimental import pallas as pl
from jax.experimental.pallas import tpu as pltpu

# ---- small synthetic BERT config (bert-base-uncased shapes scaled down) ----
B, S, H = 2, 8, 32          # batch, seq_len, hidden
NUM_HEADS = 2
HEAD_DIM = H // NUM_HEADS
INTER = 4 * H               # intermediate (FFN) size
NUM_LAYERS = 2
VOCAB = 100
MAX_POS = 16
LN_EPS = 1e-12              # BertLayerNorm eps


# ----------------------------- in-kernel helpers -----------------------------
def _layernorm(x, gamma, beta):
    mu = jnp.mean(x, axis=-1, keepdims=True)
    var = jnp.mean((x - mu) ** 2, axis=-1, keepdims=True)
    return (x - mu) * lax.rsqrt(var + LN_EPS) * gamma + beta


def _gelu(x):
    # exact (erf-based) GELU, as used by HF BERT
    return 0.5 * x * (1.0 + lax.erf(x * (1.0 / math.sqrt(2.0))))


# --------------------------------- kernel ------------------------------------
def encoder_kernel(x_ref, mask_ref, embln_ref,
                   wqkv_ref, bqkv_ref, wo_ref, w1_ref, b1_ref, w2_ref, vecs_ref,
                   out_ref, h_scr):
    """One grid step = one transformer layer. h_scr [B*S, H] persists across steps."""
    layer = pl.program_id(0)

    # --- layer 0: embedding LayerNorm into the resident hidden state ---
    @pl.when(layer == 0)
    def _():
        h_scr[...] = _layernorm(x_ref[...], embln_ref[0:1, :], embln_ref[1:2, :])

    x = h_scr[...]                                   # [B*S, H]
    mask_add = mask_ref[...]                         # [B, 1, S] additive mask

    # unpack the packed per-layer small vectors (rows of a [6, H] block)
    bo    = vecs_ref[0:1, :]
    ln1_g = vecs_ref[1:2, :]
    ln1_b = vecs_ref[2:3, :]
    b2    = vecs_ref[3:4, :]
    ln2_g = vecs_ref[4:5, :]
    ln2_b = vecs_ref[5:6, :]

    # --- self-attention: fused QKV projection on the flattened activation ---
    qkv = jnp.dot(x, wqkv_ref[...], preferred_element_type=jnp.float32) + bqkv_ref[...]
    scale = 1.0 / math.sqrt(HEAD_DIM)

    ctx_heads = []
    for hd in range(NUM_HEADS):                      # tiny static head count -> unrolled
        lo = hd * HEAD_DIM
        qh = qkv[:, lo:lo + HEAD_DIM].reshape(B, S, HEAD_DIM)
        kh = qkv[:, H + lo:H + lo + HEAD_DIM].reshape(B, S, HEAD_DIM)
        vh = qkv[:, 2 * H + lo:2 * H + lo + HEAD_DIM].reshape(B, S, HEAD_DIM)

        scores = jnp.einsum('bqd,bkd->bqk', qh, kh,
                            preferred_element_type=jnp.float32) * scale
        scores = scores + mask_add                   # [B,1,S] broadcast over query rows
        scores = scores - jnp.max(scores, axis=-1, keepdims=True)
        p = jnp.exp(scores)
        p = p * pl.reciprocal(jnp.sum(p, axis=-1, keepdims=True), approx=True)
        ctxh = jnp.einsum('bqk,bkd->bqd', p, vh,
                          preferred_element_type=jnp.float32)     # [B, S, HEAD_DIM]
        ctx_heads.append(ctxh.reshape(B * S, HEAD_DIM))
    ctx = jnp.concatenate(ctx_heads, axis=-1)        # [B*S, H]

    attn = jnp.dot(ctx, wo_ref[...], preferred_element_type=jnp.float32) + bo
    h1 = _layernorm(attn + x, ln1_g, ln1_b)          # residual + LN

    # --- feed-forward ---
    inter = _gelu(jnp.dot(h1, w1_ref[...], preferred_element_type=jnp.float32)
                  + b1_ref[...])                     # [B*S, INTER]
    ffn = jnp.dot(inter, w2_ref[...], preferred_element_type=jnp.float32) + b2
    h_new = _layernorm(ffn + h1, ln2_g, ln2_b)
    h_scr[...] = h_new                               # one contiguous store, stays in VMEM

    # --- last layer: mean pool over the sequence axis (dim=1) ---
    @pl.when(layer == pl.num_programs(0) - 1)
    def _():
        out_ref[...] = jnp.mean(h_new.reshape(B, S, H), axis=1)


# ------------------------------ pallas wrapper --------------------------------
def encoder_pallas(emb, mask_add, params):
    """emb: [B*S, H] pre-LN embedding sum; mask_add: [B, 1, S]; returns [B, H]."""
    BS = emb.shape[0]
    return pl.pallas_call(
        encoder_kernel,
        out_shape=jax.ShapeDtypeStruct((B, H), jnp.float32),
        grid_spec=pltpu.PrefetchScalarGridSpec(
            num_scalar_prefetch=0,
            grid=(NUM_LAYERS,),
            in_specs=[
                pl.BlockSpec((BS, H), lambda l: (0, 0)),              # embeddings (used at l==0)
                pl.BlockSpec((B, 1, S), lambda l: (0, 0, 0)),         # additive mask
                pl.BlockSpec((2, H), lambda l: (0, 0)),               # emb LN gamma/beta
                pl.BlockSpec((None, H, 3 * H), lambda l: (l, 0, 0)),  # wqkv
                pl.BlockSpec((None, 1, 3 * H), lambda l: (l, 0, 0)),  # bqkv
                pl.BlockSpec((None, H, H), lambda l: (l, 0, 0)),      # wo
                pl.BlockSpec((None, H, INTER), lambda l: (l, 0, 0)),  # w1
                pl.BlockSpec((None, 1, INTER), lambda l: (l, 0, 0)),  # b1
                pl.BlockSpec((None, INTER, H), lambda l: (l, 0, 0)),  # w2
                pl.BlockSpec((None, 6, H), lambda l: (l, 0, 0)),      # packed bo/LN/b2
            ],
            out_specs=pl.BlockSpec((B, H), lambda l: (0, 0)),
            scratch_shapes=[pltpu.VMEM((BS, H), jnp.float32)],        # resident hidden state
        ),
        compiler_params=pltpu.CompilerParams(
            dimension_semantics=("arbitrary",)),      # layers are sequential
        # TODO(synk): for v7x megacore at larger batch, add a leading "parallel"
        # grid axis over batch tiles (per-tile h scratch) to use both TensorCores.
    )(emb, mask_add, params['embln'], params['wqkv'], params['bqkv'],
      params['wo'], params['w1'], params['b1'], params['w2'], params['vecs'])


# ------------------------------- parameters ----------------------------------
def init_params(key):
    keys = iter(jax.random.split(key, 16))

    def dense(shape, scale=0.02):
        return (scale * jax.random.normal(next(keys), shape)).astype(jnp.float32)

    # TODO(synk): no checkpoint load — synthetic deterministic init instead of
    # BertModel.from_pretrained('bert-base-uncased').
    # Packed small vectors per layer, rows = [bo, ln1_g, ln1_b, b2, ln2_g, ln2_b].
    vec_pattern = jnp.array([0.0, 1.0, 0.0, 0.0, 1.0, 0.0], jnp.float32)
    params = {
        'word_emb': dense((VOCAB, H)),
        'pos_emb': dense((MAX_POS, H)),
        'tok_emb': dense((2, H)),
        'embln': jnp.stack([jnp.ones((H,), jnp.float32),     # row 0: gamma
                            jnp.zeros((H,), jnp.float32)]),  # row 1: beta
        'wqkv': dense((NUM_LAYERS, H, 3 * H)),
        'bqkv': jnp.zeros((NUM_LAYERS, 1, 3 * H), jnp.float32),
        'wo':   dense((NUM_LAYERS, H, H)),
        'w1':   dense((NUM_LAYERS, H, INTER)),
        'b1':   jnp.zeros((NUM_LAYERS, 1, INTER), jnp.float32),
        'w2':   dense((NUM_LAYERS, INTER, H)),
        'vecs': jnp.broadcast_to(vec_pattern[None, :, None],
                                 (NUM_LAYERS, 6, H)).astype(jnp.float32),
    }
    return params


# --------------------------------- forward -----------------------------------
@jax.jit
def bert_encoder_for_comments(input_ids, attention_mask, params):
    """input_ids: [B, S] int32; attention_mask: [B, S]; returns [B, H] mean-pooled."""
    Bb, Ss = input_ids.shape
    # embeddings (gather is glue, done in plain JAX)
    word = params['word_emb'][input_ids]                     # [B, S, H]
    pos = params['pos_emb'][:Ss][None, :, :]                 # [1, S, H]
    tok = params['tok_emb'][0][None, None, :]                # token_type_ids = 0
    emb = (word + pos + tok).reshape(Bb * Ss, H)             # pre-LN, flattened

    # BERT-style extended additive mask: (1 - mask) * -10000, broadcast over queries
    mask_add = (1.0 - attention_mask.astype(jnp.float32))[:, None, :] * -10000.0  # [B,1,S]

    # fused encoder: emb LN -> NUM_LAYERS transformer layers -> mean pool over seq
    return encoder_pallas(emb, mask_add, params)


if __name__ == "__main__":
    key = jax.random.PRNGKey(0)
    pkey, ikey = jax.random.split(key)
    params = init_params(pkey)
    input_ids = jax.random.randint(ikey, (B, S), 0, VOCAB, dtype=jnp.int32)
    attention_mask = jnp.ones((B, S), jnp.int32)

    out = bert_encoder_for_comments(input_ids, attention_mask, params)
    jax.block_until_ready(out)
    assert out.shape == (B, H) and out.dtype == jnp.float32
    assert bool(jnp.all(jnp.isfinite(out)))
    print("KERNEL_OK")
</pallas_src>

<mosaic_0001>
module attributes {stable_mosaic.version = 11 : i64} {
  func.func @encoder_kernel(%arg0: i32, %arg1: memref<16x32xf32, #tpu.memory_space<vmem>>, %arg2: memref<2x1x8xf32, #tpu.memory_space<vmem>>, %arg3: memref<2x32xf32, #tpu.memory_space<vmem>>, %arg4: memref<1x32x96xf32, #tpu.memory_space<vmem>>, %arg5: memref<1x1x96xf32, #tpu.memory_space<vmem>>, %arg6: memref<1x32x32xf32, #tpu.memory_space<vmem>>, %arg7: memref<1x32x128xf32, #tpu.memory_space<vmem>>, %arg8: memref<1x1x128xf32, #tpu.memory_space<vmem>>, %arg9: memref<1x128x32xf32, #tpu.memory_space<vmem>>, %arg10: memref<1x6x32xf32, #tpu.memory_space<vmem>>, %arg11: memref<2x32xf32, #tpu.memory_space<vmem>>, %arg12: memref<16x32xf32, #tpu.memory_space<vmem>>) attributes {dimension_semantics = [#tpu.dimension_semantics<arbitrary>], iteration_bounds = array<i64: 2>, scalar_prefetch = 0 : i64, scratch_operands = 1 : i64, tpu.core_type = #tpu.core_type<tc>, window_params = [{pipeline_mode = #tpu.pipeline_mode<synchronous>, transform_indices = @transform_0, window_bounds = array<i64: 16, 32>}, {pipeline_mode = #tpu.pipeline_mode<synchronous>, transform_indices = @transform_1, window_bounds = array<i64: 2, 1, 8>}, {pipeline_mode = #tpu.pipeline_mode<synchronous>, transform_indices = @transform_2, window_bounds = array<i64: 2, 32>}, {transform_indices = @transform_3, window_bounds = array<i64: 1, 32, 96>}, {transform_indices = @transform_4, window_bounds = array<i64: 1, 1, 96>}, {transform_indices = @transform_5, window_bounds = array<i64: 1, 32, 32>}, {transform_indices = @transform_6, window_bounds = array<i64: 1, 32, 128>}, {transform_indices = @transform_7, window_bounds = array<i64: 1, 1, 128>}, {transform_indices = @transform_8, window_bounds = array<i64: 1, 128, 32>}, {transform_indices = @transform_9, window_bounds = array<i64: 1, 6, 32>}, {pipeline_mode = #tpu.pipeline_mode<synchronous>, transform_indices = @transform_10, window_bounds = array<i64: 2, 32>}]} {
    %c0_i32 = arith.constant 0 : i32
    %0 = arith.cmpi eq, %arg0, %c0_i32 : i32
    %1 = arith.extui %0 : i1 to i32
    %c0_i32_0 = arith.constant 0 : i32
    %2 = arith.cmpi ne, %1, %c0_i32_0 : i32
    scf.if %2 {
      %c0_65 = arith.constant 0 : index
      %c0_66 = arith.constant 0 : index
      %146 = vector.load %arg1[%c0_65, %c0_66] : memref<16x32xf32, #tpu.memory_space<vmem>>, vector<16x32xf32>
      %c0_67 = arith.constant 0 : index
      %c0_68 = arith.constant 0 : index
      %147 = vector.load %arg3[%c0_67, %c0_68] : memref<2x32xf32, #tpu.memory_space<vmem>>, vector<1x32xf32>
      %c1_69 = arith.constant 1 : index
      %c0_70 = arith.constant 0 : index
      %148 = vector.load %arg3[%c1_69, %c0_70] : memref<2x32xf32, #tpu.memory_space<vmem>>, vector<1x32xf32>
      %cst_71 = arith.constant dense<0.000000e+00> : vector<16xf32>
      %149 = vector.multi_reduction <add>, %146, %cst_71 [1] : vector<16x32xf32> to vector<16xf32>
      %150 = vector.shape_cast %149 : vector<16xf32> to vector<16x1xf32>
      %cst_72 = arith.constant 3.200000e+01 : f32
      %151 = vector.broadcast %cst_72 : f32 to vector<16x1xf32>
      %152 = arith.divf %150, %151 : vector<16x1xf32>
      %153 = vector.broadcast %152 : vector<16x1xf32> to vector<16x32xf32>
      %154 = arith.subf %146, %153 : vector<16x32xf32>
      %155 = arith.mulf %154, %154 : vector<16x32xf32>
      %cst_73 = arith.constant dense<0.000000e+00> : vector<16xf32>
      %156 = vector.multi_reduction <add>, %155, %cst_73 [1] : vector<16x32xf32> to vector<16xf32>
      %157 = vector.shape_cast %156 : vector<16xf32> to vector<16x1xf32>
      %cst_74 = arith.constant 3.200000e+01 : f32
      %158 = vector.broadcast %cst_74 : f32 to vector<16x1xf32>
      %159 = arith.divf %157, %158 : vector<16x1xf32>
      %160 = vector.broadcast %152 : vector<16x1xf32> to vector<16x32xf32>
      %161 = arith.subf %146, %160 : vector<16x32xf32>
      %cst_75 = arith.constant 9.99999996E-13 : f32
      %162 = vector.broadcast %cst_75 : f32 to vector<16x1xf32>
      %163 = arith.addf %159, %162 : vector<16x1xf32>
      %164 = math.rsqrt %163 : vector<16x1xf32>
      %165 = vector.broadcast %164 : vector<16x1xf32> to vector<16x32xf32>
      %166 = arith.mulf %161, %165 : vector<16x32xf32>
      %167 = vector.broadcast %147 : vector<1x32xf32> to vector<16x32xf32>
      %168 = arith.mulf %166, %167 : vector<16x32xf32>
      %169 = vector.broadcast %148 : vector<1x32xf32> to vector<16x32xf32>
      %170 = arith.addf %168, %169 : vector<16x32xf32>
      %c0_76 = arith.constant 0 : index
      %c0_77 = arith.constant 0 : index
      %171 = vector.load %arg12[%c0_76, %c0_77] : memref<16x32xf32, #tpu.memory_space<vmem>>, vector<16x32xf32>
      tpu.vector_store %arg12[%c0_76, %c0_77], %170 {strides = array<i32>} : memref<16x32xf32, #tpu.memory_space<vmem>>, vector<16x32xf32>,
    } else {
    }
    %c0 = arith.constant 0 : index
    %c0_1 = arith.constant 0 : index
    %3 = vector.load %arg12[%c0, %c0_1] : memref<16x32xf32, #tpu.memory_space<vmem>>, vector<16x32xf32>
    %c0_2 = arith.constant 0 : index
    %c0_3 = arith.constant 0 : index
    %c0_4 = arith.constant 0 : index
    %4 = vector.load %arg2[%c0_2, %c0_3, %c0_4] : memref<2x1x8xf32, #tpu.memory_space<vmem>>, vector<2x1x8xf32>
    %c0_5 = arith.constant 0 : index
    %c0_6 = arith.constant 0 : index
    %c0_7 = arith.constant 0 : index
    %5 = vector.load %arg10[%c0_5, %c0_6, %c0_7] : memref<1x6x32xf32, #tpu.memory_space<vmem>>, vector<1x1x32xf32>
    %6 = vector.shape_cast %5 : vector<1x1x32xf32> to vector<1x32xf32>
    %c0_8 = arith.constant 0 : index
    %c1 = arith.constant 1 : index
    %c0_9 = arith.constant 0 : index
    %7 = vector.load %arg10[%c0_8, %c1, %c0_9] : memref<1x6x32xf32, #tpu.memory_space<vmem>>, vector<1x1x32xf32>
    %8 = vector.shape_cast %7 : vector<1x1x32xf32> to vector<1x32xf32>
    %c0_10 = arith.constant 0 : index
    %c2 = arith.constant 2 : index
    %c0_11 = arith.constant 0 : index
    %9 = vector.load %arg10[%c0_10, %c2, %c0_11] : memref<1x6x32xf32, #tpu.memory_space<vmem>>, vector<1x1x32xf32>
    %10 = vector.shape_cast %9 : vector<1x1x32xf32> to vector<1x32xf32>
    %c0_12 = arith.constant 0 : index
    %c3 = arith.constant 3 : index
    %c0_13 = arith.constant 0 : index
    %11 = vector.load %arg10[%c0_12, %c3, %c0_13] : memref<1x6x32xf32, #tpu.memory_space<vmem>>, vector<1x1x32xf32>
    %12 = vector.shape_cast %11 : vector<1x1x32xf32> to vector<1x32xf32>
    %c0_14 = arith.constant 0 : index
    %c4 = arith.constant 4 : index
    %c0_15 = arith.constant 0 : index
    %13 = vector.load %arg10[%c0_14, %c4, %c0_15] : memref<1x6x32xf32, #tpu.memory_space<vmem>>, vector<1x1x32xf32>
    %14 = vector.shape_cast %13 : vector<1x1x32xf32> to vector<1x32xf32>
    %c0_16 = arith.constant 0 : index
    %c5 = arith.constant 5 : index
    %c0_17 = arith.constant 0 : index
    %15 = vector.load %arg10[%c0_16, %c5, %c0_17] : memref<1x6x32xf32, #tpu.memory_space<vmem>>, vector<1x1x32xf32>
    %16 = vector.shape_cast %15 : vector<1x1x32xf32> to vector<1x32xf32>
    %c0_18 = arith.constant 0 : index
    %c0_19 = arith.constant 0 : index
    %c0_20 = arith.constant 0 : index
    %17 = vector.load %arg4[%c0_18, %c0_19, %c0_20] : memref<1x32x96xf32, #tpu.memory_space<vmem>>, vector<1x32x96xf32>
    %18 = vector.shape_cast %17 : vector<1x32x96xf32> to vector<32x96xf32>
    %cst = arith.constant dense<0.000000e+00> : vector<16x96xf32>
    %19 = tpu.matmul %3, %18, %cst {dimension_numbers = #tpu.dot_dimension_numbers<[1], [0], [0], [1], [0, 0, 1, 1], [], []>} : vector<16x32xf32>, vector<32x96xf32>, vector<16x96xf32> -> vector<16x96xf32>
    %c0_21 = arith.constant 0 : index
    %c0_22 = arith.constant 0 : index
    %c0_23 = arith.constant 0 : index
    %20 = vector.load %arg5[%c0_21, %c0_22, %c0_23] : memref<1x1x96xf32, #tpu.memory_space<vmem>>, vector<1x1x96xf32>
    %21 = vector.shape_cast %20 : vector<1x1x96xf32> to vector<1x96xf32>
    %22 = vector.broadcast %21 : vector<1x96xf32> to vector<16x96xf32>
    %23 = arith.addf %19, %22 : vector<16x96xf32>
    %24 = vector.extract_strided_slice %23 {offsets = [0, 0], sizes = [16, 16], strides = [1, 1]} : vector<16x96xf32> to vector<16x16xf32>
    %25 = vector.shape_cast %24 : vector<16x16xf32> to vector<2x8x16xf32>
    %26 = vector.extract_strided_slice %23 {offsets = [0, 32], sizes = [16, 16], strides = [1, 1]} : vector<16x96xf32> to vector<16x16xf32>
    %27 = vector.shape_cast %26 : vector<16x16xf32> to vector<2x8x16xf32>
    %28 = vector.extract_strided_slice %23 {offsets = [0, 64], sizes = [16, 16], strides = [1, 1]} : vector<16x96xf32> to vector<16x16xf32>
    %29 = vector.shape_cast %28 : vector<16x16xf32> to vector<2x8x16xf32>
    "tpu.trace_start"() <{level = 10 : i32, message = "bqd,bkd->bqk"}> : () -> ()
    %cst_24 = arith.constant dense<0.000000e+00> : vector<2x8x8xf32>
    %30 = tpu.matmul %25, %27, %cst_24 {dimension_numbers = #tpu.dot_dimension_numbers<[2], [2], [1], [1], [0, 0, 0, 1, 1, 1], [0], [0]>} : vector<2x8x16xf32>, vector<2x8x16xf32>, vector<2x8x8xf32> -> vector<2x8x8xf32>
    "tpu.trace_stop"() : () -> ()
    %cst_25 = arith.constant 2.500000e-01 : f32
    %31 = vector.broadcast %cst_25 : f32 to vector<2x8x8xf32>
    %32 = arith.mulf %30, %31 : vector<2x8x8xf32>
    %33 = vector.broadcast %4 : vector<2x1x8xf32> to vector<2x8x8xf32>
    %34 = arith.addf %32, %33 : vector<2x8x8xf32>
    %cst_26 = arith.constant dense<0xFF800000> : vector<2x8xf32>
    %35 = vector.multi_reduction <maximumf>, %34, %cst_26 [2] : vector<2x8x8xf32> to vector<2x8xf32>
    %36 = vector.shape_cast %35 : vector<2x8xf32> to vector<2x8x1xf32>
    %37 = vector.broadcast %36 : vector<2x8x1xf32> to vector<2x8x8xf32>
    %38 = arith.subf %34, %37 : vector<2x8x8xf32>
    %39 = math.exp %38 : vector<2x8x8xf32>
    %cst_27 = arith.constant dense<0.000000e+00> : vector<2x8xf32>
    %40 = vector.multi_reduction <add>, %39, %cst_27 [2] : vector<2x8x8xf32> to vector<2x8xf32>
    %41 = vector.shape_cast %40 : vector<2x8xf32> to vector<2x8x1xf32>
    %42 = tpu.reciprocal %41 {approx = true} : vector<2x8x1xf32> -> vector<2x8x1xf32>
    %43 = vector.broadcast %42 : vector<2x8x1xf32> to vector<2x8x8xf32>
    %44 = arith.mulf %39, %43 : vector<2x8x8xf32>
    "tpu.trace_start"() <{level = 10 : i32, message = "bqk,bkd->bqd"}> : () -> ()
    %cst_28 = arith.constant dense<0.000000e+00> : vector<2x8x16xf32>
    %45 = tpu.matmul %44, %29, %cst_28 {dimension_numbers = #tpu.dot_dimension_numbers<[2], [1], [1], [2], [0, 0, 0, 1, 1, 2], [0], [0]>} : vector<2x8x8xf32>, vector<2x8x16xf32>, vector<2x8x16xf32> -> vector<2x8x16xf32>
    "tpu.trace_stop"() : () -> ()
    %46 = vector.shape_cast %45 : vector<2x8x16xf32> to vector<16x16xf32>
    %47 = vector.extract_strided_slice %23 {offsets = [0, 16], sizes = [16, 16], strides = [1, 1]} : vector<16x96xf32> to vector<16x16xf32>
    %48 = vector.shape_cast %47 : vector<16x16xf32> to vector<2x8x16xf32>
    %49 = vector.extract_strided_slice %23 {offsets = [0, 48], sizes = [16, 16], strides = [1, 1]} : vector<16x96xf32> to vector<16x16xf32>
    %50 = vector.shape_cast %49 : vector<16x16xf32> to vector<2x8x16xf32>
    %51 = vector.extract_strided_slice %23 {offsets = [0, 80], sizes = [16, 16], strides = [1, 1]} : vector<16x96xf32> to vector<16x16xf32>
    %52 = vector.shape_cast %51 : vector<16x16xf32> to vector<2x8x16xf32>
    "tpu.trace_start"() <{level = 10 : i32, message = "bqd,bkd->bqk"}> : () -> ()
    %cst_29 = arith.constant dense<0.000000e+00> : vector<2x8x8xf32>
    %53 = tpu.matmul %48, %50, %cst_29 {dimension_numbers = #tpu.dot_dimension_numbers<[2], [2], [1], [1], [0, 0, 0, 1, 1, 1], [0], [0]>} : vector<2x8x16xf32>, vector<2x8x16xf32>, vector<2x8x8xf32> -> vector<2x8x8xf32>
    "tpu.trace_stop"() : () -> ()
    %cst_30 = arith.constant 2.500000e-01 : f32
    %54 = vector.broadcast %cst_30 : f32 to vector<2x8x8xf32>
    %55 = arith.mulf %53, %54 : vector<2x8x8xf32>
    %56 = vector.broadcast %4 : vector<2x1x8xf32> to vector<2x8x8xf32>
    %57 = arith.addf %55, %56 : vector<2x8x8xf32>
    %cst_31 = arith.constant dense<0xFF800000> : vector<2x8xf32>
    %58 = vector.multi_reduction <maximumf>, %57, %cst_31 [2] : vector<2x8x8xf32> to vector<2x8xf32>
    %59 = vector.shape_cast %58 : vector<2x8xf32> to vector<2x8x1xf32>
    %60 = vector.broadcast %59 : vector<2x8x1xf32> to vector<2x8x8xf32>
    %61 = arith.subf %57, %60 : vector<2x8x8xf32>
    %62 = math.exp %61 : vector<2x8x8xf32>
    %cst_32 = arith.constant dense<0.000000e+00> : vector<2x8xf32>
    %63 = vector.multi_reduction <add>, %62, %cst_32 [2] : vector<2x8x8xf32> to vector<2x8xf32>
    %64 = vector.shape_cast %63 : vector<2x8xf32> to vector<2x8x1xf32>
    %65 = tpu.reciprocal %64 {approx = true} : vector<2x8x1xf32> -> vector<2x8x1xf32>
    %66 = vector.broadcast %65 : vector<2x8x1xf32> to vector<2x8x8xf32>
    %67 = arith.mulf %62, %66 : vector<2x8x8xf32>
    "tpu.trace_start"() <{level = 10 : i32, message = "bqk,bkd->bqd"}> : () -> ()
    %cst_33 = arith.constant dense<0.000000e+00> : vector<2x8x16xf32>
    %68 = tpu.matmul %67, %52, %cst_33 {dimension_numbers = #tpu.dot_dimension_numbers<[2], [1], [1], [2], [0, 0, 0, 1, 1, 2], [0], [0]>} : vector<2x8x8xf32>, vector<2x8x16xf32>, vector<2x8x16xf32> -> vector<2x8x16xf32>
    "tpu.trace_stop"() : () -> ()
    %69 = vector.shape_cast %68 : vector<2x8x16xf32> to vector<16x16xf32>
    %70 = tpu.concatenate %46, %69 in 1 : vector<16x16xf32>, vector<16x16xf32> -> vector<16x32xf32>
    %c0_34 = arith.constant 0 : index
    %c0_35 = arith.constant 0 : index
    %c0_36 = arith.constant 0 : index
    %71 = vector.load %arg6[%c0_34, %c0_35, %c0_36] : memref<1x32x32xf32, #tpu.memory_space<vmem>>, vector<1x32x32xf32>
    %72 = vector.shape_cast %71 : vector<1x32x32xf32> to vector<32x32xf32>
    %cst_37 = arith.constant dense<0.000000e+00> : vector<16x32xf32>
    %73 = tpu.matmul %70, %72, %cst_37 {dimension_numbers = #tpu.dot_dimension_numbers<[1], [0], [0], [1], [0, 0, 1, 1], [], []>} : vector<16x32xf32>, vector<32x32xf32>, vector<16x32xf32> -> vector<16x32xf32>
    %74 = vector.broadcast %6 : vector<1x32xf32> to vector<16x32xf32>
    %75 = arith.addf %73, %74 : vector<16x32xf32>
    %76 = arith.addf %75, %3 : vector<16x32xf32>
    %cst_38 = arith.constant dense<0.000000e+00> : vector<16xf32>
    %77 = vector.multi_reduction <add>, %76, %cst_38 [1] : vector<16x32xf32> to vector<16xf32>
    %78 = vector.shape_cast %77 : vector<16xf32> to vector<16x1xf32>
    %cst_39 = arith.constant 3.200000e+01 : f32
    %79 = vector.broadcast %cst_39 : f32 to vector<16x1xf32>
    %80 = arith.divf %78, %79 : vector<16x1xf32>
    %81 = vector.broadcast %80 : vector<16x1xf32> to vector<16x32xf32>
    %82 = arith.subf %76, %81 : vector<16x32xf32>
    %83 = arith.mulf %82, %82 : vector<16x32xf32>
    %cst_40 = arith.constant dense<0.000000e+00> : vector<16xf32>
    %84 = vector.multi_reduction <add>, %83, %cst_40 [1] : vector<16x32xf32> to vector<16xf32>
    %85 = vector.shape_cast %84 : vector<16xf32> to vector<16x1xf32>
    %cst_41 = arith.constant 3.200000e+01 : f32
    %86 = vector.broadcast %cst_41 : f32 to vector<16x1xf32>
    %87 = arith.divf %85, %86 : vector<16x1xf32>
    %88 = vector.broadcast %80 : vector<16x1xf32> to vector<16x32xf32>
    %89 = arith.subf %76, %88 : vector<16x32xf32>
    %cst_42 = arith.constant 9.99999996E-13 : f32
    %90 = vector.broadcast %cst_42 : f32 to vector<16x1xf32>
    %91 = arith.addf %87, %90 : vector<16x1xf32>
    %92 = math.rsqrt %91 : vector<16x1xf32>
    %93 = vector.broadcast %92 : vector<16x1xf32> to vector<16x32xf32>
    %94 = arith.mulf %89, %93 : vector<16x32xf32>
    %95 = vector.broadcast %8 : vector<1x32xf32> to vector<16x32xf32>
    %96 = arith.mulf %94, %95 : vector<16x32xf32>
    %97 = vector.broadcast %10 : vector<1x32xf32> to vector<16x32xf32>
    %98 = arith.addf %96, %97 : vector<16x32xf32>
    %c0_43 = arith.constant 0 : index
    %c0_44 = arith.constant 0 : index
    %c0_45 = arith.constant 0 : index
    %99 = vector.load %arg7[%c0_43, %c0_44, %c0_45] : memref<1x32x128xf32, #tpu.memory_space<vmem>>, vector<1x32x128xf32>
    %100 = vector.shape_cast %99 : vector<1x32x128xf32> to vector<32x128xf32>
    %cst_46 = arith.constant dense<0.000000e+00> : vector<16x128xf32>
    %101 = tpu.matmul %98, %100, %cst_46 {dimension_numbers = #tpu.dot_dimension_numbers<[1], [0], [0], [1], [0, 0, 1, 1], [], []>} : vector<16x32xf32>, vector<32x128xf32>, vector<16x128xf32> -> vector<16x128xf32>
    %c0_47 = arith.constant 0 : index
    %c0_48 = arith.constant 0 : index
    %c0_49 = arith.constant 0 : index
    %102 = vector.load %arg8[%c0_47, %c0_48, %c0_49] : memref<1x1x128xf32, #tpu.memory_space<vmem>>, vector<1x1x128xf32>
    %103 = vector.shape_cast %102 : vector<1x1x128xf32> to vector<1x128xf32>
    %104 = vector.broadcast %103 : vector<1x128xf32> to vector<16x128xf32>
    %105 = arith.addf %101, %104 : vector<16x128xf32>
    %cst_50 = arith.constant 5.000000e-01 : f32
    %106 = vector.broadcast %cst_50 : f32 to vector<16x128xf32>
    %107 = arith.mulf %106, %105 : vector<16x128xf32>
    %cst_51 = arith.constant 0.707106769 : f32
    %108 = vector.broadcast %cst_51 : f32 to vector<16x128xf32>
    %109 = arith.mulf %105, %108 : vector<16x128xf32>
    %110 = math.erf %109 : vector<16x128xf32>
    %cst_52 = arith.constant 1.000000e+00 : f32
    %111 = vector.broadcast %cst_52 : f32 to vector<16x128xf32>
    %112 = arith.addf %111, %110 : vector<16x128xf32>
    %113 = arith.mulf %107, %112 : vector<16x128xf32>
    %c0_53 = arith.constant 0 : index
    %c0_54 = arith.constant 0 : index
    %c0_55 = arith.constant 0 : index
    %114 = vector.load %arg9[%c0_53, %c0_54, %c0_55] : memref<1x128x32xf32, #tpu.memory_space<vmem>>, vector<1x128x32xf32>
    %115 = vector.shape_cast %114 : vector<1x128x32xf32> to vector<128x32xf32>
    %cst_56 = arith.constant dense<0.000000e+00> : vector<16x32xf32>
    %116 = tpu.matmul %113, %115, %cst_56 {dimension_numbers = #tpu.dot_dimension_numbers<[1], [0], [0], [1], [0, 0, 1, 1], [], []>} : vector<16x128xf32>, vector<128x32xf32>, vector<16x32xf32> -> vector<16x32xf32>
    %117 = vector.broadcast %12 : vector<1x32xf32> to vector<16x32xf32>
    %118 = arith.addf %116, %117 : vector<16x32xf32>
    %119 = arith.addf %118, %98 : vector<16x32xf32>
    %cst_57 = arith.constant dense<0.000000e+00> : vector<16xf32>
    %120 = vector.multi_reduction <add>, %119, %cst_57 [1] : vector<16x32xf32> to vector<16xf32>
    %121 = vector.shape_cast %120 : vector<16xf32> to vector<16x1xf32>
    %cst_58 = arith.constant 3.200000e+01 : f32
    %122 = vector.broadcast %cst_58 : f32 to vector<16x1xf32>
    %123 = arith.divf %121, %122 : vector<16x1xf32>
    %124 = vector.broadcast %123 : vector<16x1xf32> to vector<16x32xf32>
    %125 = arith.subf %119, %124 : vector<16x32xf32>
    %126 = arith.mulf %125, %125 : vector<16x32xf32>
    %cst_59 = arith.constant dense<0.000000e+00> : vector<16xf32>
    %127 = vector.multi_reduction <add>, %126, %cst_59 [1] : vector<16x32xf32> to vector<16xf32>
    %128 = vector.shape_cast %127 : vector<16xf32> to vector<16x1xf32>
    %cst_60 = arith.constant 3.200000e+01 : f32
    %129 = vector.broadcast %cst_60 : f32 to vector<16x1xf32>
    %130 = arith.divf %128, %129 : vector<16x1xf32>
    %131 = vector.broadcast %123 : vector<16x1xf32> to vector<16x32xf32>
    %132 = arith.subf %119, %131 : vector<16x32xf32>
    %cst_61 = arith.constant 9.99999996E-13 : f32
    %133 = vector.broadcast %cst_61 : f32 to vector<16x1xf32>
    %134 = arith.addf %130, %133 : vector<16x1xf32>
    %135 = math.rsqrt %134 : vector<16x1xf32>
    %136 = vector.broadcast %135 : vector<16x1xf32> to vector<16x32xf32>
    %137 = arith.mulf %132, %136 : vector<16x32xf32>
    %138 = vector.broadcast %14 : vector<1x32xf32> to vector<16x32xf32>
    %139 = arith.mulf %137, %138 : vector<16x32xf32>
    %140 = vector.broadcast %16 : vector<1x32xf32> to vector<16x32xf32>
    %141 = arith.addf %139, %140 : vector<16x32xf32>
    %c0_62 = arith.constant 0 : index
    %c0_63 = arith.constant 0 : index
    %142 = vector.load %arg12[%c0_62, %c0_63] : memref<16x32xf32, #tpu.memory_space<vmem>>, vector<16x32xf32>
    tpu.vector_store %arg12[%c0_62, %c0_63], %141 {strides = array<i32>} : memref<16x32xf32, #tpu.memory_space<vmem>>, vector<16x32xf32>,
    %c1_i32 = arith.constant 1 : i32
    %143 = arith.cmpi eq, %arg0, %c1_i32 : i32
    %144 = arith.extui %143 : i1 to i32
    %c0_i32_64 = arith.constant 0 : i32
    %145 = arith.cmpi ne, %144, %c0_i32_64 : i32
    scf.if %145 {
      %146 = vector.shape_cast %141 : vector<16x32xf32> to vector<2x8x32xf32>
      %cst_65 = arith.constant dense<0.000000e+00> : vector<2x32xf32>
      %147 = vector.multi_reduction <add>, %146, %cst_65 [1] : vector<2x8x32xf32> to vector<2x32xf32>
      %cst_66 = arith.constant 8.000000e+00 : f32
      %148 = vector.broadcast %cst_66 : f32 to vector<2x32xf32>
      %149 = arith.divf %147, %148 : vector<2x32xf32>
      %c0_67 = arith.constant 0 : index
      %c0_68 = arith.constant 0 : index
      %150 = vector.load %arg11[%c0_67, %c0_68] : memref<2x32xf32, #tpu.memory_space<vmem>>, vector<2x32xf32>
      tpu.vector_store %arg11[%c0_67, %c0_68], %149 {strides = array<i32>} : memref<2x32xf32, #tpu.memory_space<vmem>>, vector<2x32xf32>,
    } else {
    }
    return
  }
  func.func @transform_0(%arg0: i32) -> (i32, i32) {
    %c0_i32 = arith.constant 0 : i32
    %c0_i32_0 = arith.constant 0 : i32
    %c0_i32_1 = arith.constant 0 : i32
    return %c0_i32, %c0_i32_0 : i32, i32
  }
  func.func @transform_1(%arg0: i32) -> (i32, i32, i32) {
    %c0_i32 = arith.constant 0 : i32
    %c0_i32_0 = arith.constant 0 : i32
    %c0_i32_1 = arith.constant 0 : i32
    %c0_i32_2 = arith.constant 0 : i32
    return %c0_i32, %c0_i32_0, %c0_i32_1 : i32, i32, i32
  }
  func.func @transform_2(%arg0: i32) -> (i32, i32) {
    %c0_i32 = arith.constant 0 : i32
    %c0_i32_0 = arith.constant 0 : i32
    %c0_i32_1 = arith.constant 0 : i32
    return %c0_i32, %c0_i32_0 : i32, i32
  }
  func.func @transform_3(%arg0: i32) -> (i32, i32, i32) {
    %c0_i32 = arith.constant 0 : i32
    %c0_i32_0 = arith.constant 0 : i32
    %c0_i32_1 = arith.constant 0 : i32
    return %arg0, %c0_i32, %c0_i32_0 : i32, i32, i32
  }
  func.func @transform_4(%arg0: i32) -> (i32, i32, i32) {
    %c0_i32 = arith.constant 0 : i32
    %c0_i32_0 = arith.constant 0 : i32
    %c0_i32_1 = arith.constant 0 : i32
    return %arg0, %c0_i32, %c0_i32_0 : i32, i32, i32
  }
  func.func @transform_5(%arg0: i32) -> (i32, i32, i32) {
    %c0_i32 = arith.constant 0 : i32
    %c0_i32_0 = arith.constant 0 : i32
    %c0_i32_1 = arith.constant 0 : i32
    return %arg0, %c0_i32, %c0_i32_0 : i32, i32, i32
  }
  func.func @transform_6(%arg0: i32) -> (i32, i32, i32) {
    %c0_i32 = arith.constant 0 : i32
    %c0_i32_0 = arith.constant 0 : i32
    %c0_i32_1 = arith.constant 0 : i32
    return %arg0, %c0_i32, %c0_i32_0 : i32, i32, i32
  }
  func.func @transform_7(%arg0: i32) -> (i32, i32, i32) {
    %c0_i32 = arith.constant 0 : i32
    %c0_i32_0 = arith.constant 0 : i32
    %c0_i32_1 = arith.constant 0 : i32
    return %arg0, %c0_i32, %c0_i32_0 : i32, i32, i32
  }
  func.func @transform_8(%arg0: i32) -> (i32, i32, i32) {
    %c0_i32 = arith.constant 0 : i32
    %c0_i32_0 = arith.constant 0 : i32
    %c0_i32_1 = arith.constant 0 : i32
    return %arg0, %c0_i32, %c0_i32_0 : i32, i32, i32
  }
  func.func @transform_9(%arg0: i32) -> (i32, i32, i32) {
    %c0_i32 = arith.constant 0 : i32
    %c0_i32_0 = arith.constant 0 : i32
    %c0_i32_1 = arith.constant 0 : i32
    return %arg0, %c0_i32, %c0_i32_0 : i32, i32, i32
  }
  func.func @transform_10(%arg0: i32) -> (i32, i32) {
    %c0_i32 = arith.constant 0 : i32
    %c0_i32_0 = arith.constant 0 : i32
    %c0_i32_1 = arith.constant 0 : i32
    return %c0_i32, %c0_i32_0 : i32, i32
  }
}

</mosaic_0001>

<bundles_post_ra>
// kernel: bert_encoder_for_comments.1
= control target key start
LH: loop header
LB: loop body
LE: loop exit
PB: predicated region body
PF: predicated region fallthrough
CT: control target
= control target key end

     0   :  { %15 = vsyncpa [#allocation4], 0  ;;  %s2229_s13 = smov 0   ;;  %s2477_s0 = inlined_call_operand.vmem [shape: f32[16,32], index: 0, kind: input, shape index: {}]   ;;  %s2478_s1 = inlined_call_operand.vmem [shape: f32[2,1,8], index: 1, kind: input, shape index: {}]   ;;  %s2479_s2 = inlined_call_operand.vmem [shape: f32[2,32], index: 2, kind: input, shape index: {}]   ;;  %s2480_s3 = inlined_call_operand.vmem [shape: f32[2,32,96], index: 3, kind: input, shape index: {}]   ;;  %s2481_s4 = inlined_call_operand.vmem [shape: f32[2,1,96], index: 4, kind: input, shape index: {}]   ;;  %s2482_s5 = inlined_call_operand.vmem [shape: f32[2,32,32], index: 5, kind: input, shape index: {}]   ;;  %s2483_s6 = inlined_call_operand.vmem [shape: f32[2,32,128], index: 6, kind: input, shape index: {}]   ;;  %s2484_s7 = inlined_call_operand.vmem [shape: f32[2,1,128], index: 7, kind: input, shape index: {}]   ;;  %s2485_s8 = inlined_call_operand.vmem [shape: f32[2,128,32], index: 8, kind: input, shape index: {}]   ;;  %s2486_s9 = inlined_call_operand.vmem [shape: f32[2,6,32], index: 9, kind: input, shape index: {}]   ;;  %s2487_s10 = inlined_call_operand.hbm [shape: f32[2,32], index: 10, kind: output, shape index: {}]  }
   0x1 LB: > { %s2235_s14 = sadd.s32 4294967295, %s2163_s13   ;;  %p1806_p0 = scmp.ge.s32.totalorder %s2163_s13, 1  ;;  %s2163_s13 = sphi %s2229_s13, %s21_s13  }
   0x2   : > { %p363_p1 = scmp.lt.s32.totalorder %s2163_s13, 3 }
   0x4   : > { %p364_p2 = pnand %p1806_p0, %p363_p1 }
   0x5   : > { %p421_p3 = scmp.lt.s32.totalorder (!%p364_p2), %s2235_s14, 1  ;;  %p1816_p4 = scmp.ne.s32.totalorder (!%p364_p2), %s2235_s14, 0 }
   0x6   : > { %367 = sbr.rel (%p364_p2) target bundleno = 3412 (0xd54), region = 60 }
   0xd   : > { %s2241_s15 = scalar_select %p421_p3, %s2235_s14, 1 }
   0xe   : > { %454 = sbr.rel (%p1816_p4) target bundleno = 333 (0x14d), region = 64  ;;  %v455_v0 = vld [vmem:[%s2477_s0] sm:$0xff] (!%p1816_p4)  ;;  %vm459_vm0 = vcmask (!%p1816_p4), 261120   ;;  %v456_v1 = vld [vmem:[%s2477_s0 + $0x8] sm:$0xff] (!%p1816_p4) }
   0xf   : > { %s1852_s16 = sshll.u32 %s2241_s15, 5  ;;  %s441_s11 = scalar_lea.vmem %s2484_s7, %s2241_s15  ;;  %v460_v2 = vsel (!%p1816_p4), %vm459_vm0, %v455_v0, 0.0  ;;  %v463_v3 = vsel (!%p1816_p4), %vm459_vm0, %v456_v1, 0.0  ;;  %v1817_v21 = vld [vmem:[%s2479_s2] ss:$0 sm:$0xff] (!%p1816_p4) }
  0x10   : > { %s2251_s22 = scalar_lea.vmem %s2480_s3, %s1852_s16  ;;  %s2256_s25 = scalar_lea.vmem %s2482_s5, %s1852_s16  ;;  %461 = vadd.xlane.f32.xlu0 (!%p1816_p4), %v460_v2  ;;  %v1818_v23 = vld [vmem:[%s2479_s2 + $0x1] ss:$0 sm:$0xff] (!%p1816_p4) }
  0x11   : > { %s2261_s28 = scalar_lea.vmem %s2483_s6, %s1852_s16  ;;  %s1855_s12 = sshll.u32 %s2241_s15, 7 }
  0x12   : > { %s1815_s17 = sshll.u32 %s2241_s15, 3  ;;  %s2272_s21 = scalar_lea.vmem %s2485_s8, %s1855_s12 }
  0x13   : > { %s2277_s24 = scalar_lea.vmem %s2486_s9, %s1815_s17 }
  0x14   : > { %464 = vadd.xlane.f32.xlu0 (!%p1816_p4), %v463_v3 }
  0x9d   : > { %v462_v4 = vpop.xlane.xlu0 %461 }
  0x9e   : > { %v467_v5 = vmul.f32 0.03125, %v462_v4 }
  0xa0   : > { %v469_v6 = vsub.f32 %v455_v0, %v467_v5 }
  0xa1   : > { %v465_v7 = vpop.xlane.xlu0 %464 }
  0xa2   : > { %v468_v8 = vmul.f32 0.03125, %v465_v7  ;;  %v471_v9 = vmul.f32 %v469_v6, %v469_v6 }
  0xa4   : > { %v470_v10 = vsub.f32 %v456_v1, %v468_v8  ;;  %v473_v11 = vsel %vm459_vm0, %v471_v9, 0.0 }
  0xa5   : > { %474 = vadd.xlane.f32.xlu1 %v473_v11 }
  0xa6   : > { %v472_v12 = vmul.f32 %v470_v10, %v470_v10 }
  0xa8   : > { %v476_v13 = vsel %vm459_vm0, %v472_v12, 0.0 }
  0xa9   : > { %477 = vadd.xlane.f32.xlu1 %v476_v13 }
 0x132   : > { %v475_v14 = vpop.xlane.xlu1 %474 }
 0x133   : > { %v479_v15 = vmul.f32 0.03125, %v475_v14 }
 0x135   : > { %v481_v16 = vadd.f32 1e-12, %v479_v15 }
 0x136   : > { %v478_v17 = vpop.xlane.xlu1 %477 }
 0x137   : > { %2095 = vrsqrt.f32 %v481_v16  ;;  %v480_v18 = vmul.f32 0.03125, %v478_v17 }
 0x139   : > { %v482_v19 = vadd.f32 1e-12, %v480_v18 }
 0x13b   : > { %2097 = vrsqrt.f32 %v482_v19 }
 0x141   : > { %v2096_v20 = vpop.eup %2095 }
 0x142   : > { %v485_v22 = vmul.f32 %v2096_v20, %v469_v6 }
 0x144   : > { %v491_v24 = vmul.f32 %v1817_v21, %v485_v22 }
 0x145   : > { %v2098_v25 = vpop.eup %2097 }
 0x146   : > { %v497_v26 = vadd.f32 %v1818_v23, %v491_v24  ;;  %v486_v27 = vmul.f32 %v2098_v25, %v470_v10 }
 0x148   : > { %499 = vst.msk [vmem:[#allocation2] sm:$0xff] %vm459_vm0, %v497_v26  ;;  %v492_v28 = vmul.f32 %v1817_v21, %v486_v27 }
 0x14a   : > { %v498_v29 = vadd.f32 %v1818_v23, %v492_v28 }
 0x14c   : > { %500 = vst.msk [vmem:[#allocation2 + $0x8] sm:$0xff] %vm459_vm0, %v498_v29 }
 0x14d PF: > { %v511_v30 = vld [vmem:[%s2251_s22] sm:$0xff]  ;;  %v512_v31 = vld [vmem:[%s2251_s22 + $0x8] sm:$0xff]  ;;  %v513_v32 = vld [vmem:[%s2251_s22 + $0x10] sm:$0xff]  ;;  %vm522_vm1 = vcmask 261120   ;;  %v2165_v38 = vmov 0.0   ;;  %vm2166_vm2 = vmmov 0   ;;  %s2488_s20 = scalar_lea.vmem %s2481_s4, %s2241_s15 }
 0x14e   : > { %v2016_v33 = vpack.c.bf16 %v512_v31, %v511_v30  ;;  %v514_v34 = vld [vmem:[%s2251_s22 + $0x18] sm:$0xff]  ;;  %1929 = vmatprep.subr.mxu0 %v2165_v38  ;;  %1931 = vmatprep.mubr.msk.f32.mxu0 %vm2166_vm2, %v2165_v38  ;;  %v1819_v39 = vld [vmem:[%s2488_s20] ss:$0 sm:$0xff]  ;;  %s2167_s23 = smov 96   ;;  %vm607_vm3 = vcmask 130048   ;;  %vm775_vm4 = vcmask 64512  }
 0x14f   : > { %v2302_v35 = vld [vmem:[#allocation2] sm:$0xff]  ;;  %v2020_v36 = vpack.c.bf16 %v514_v34, %v513_v32  ;;  %s2168_s19 = smov 64   ;;  %s2169_s30 = smov 80  }
 0x150   : > { %1916 = vmatprep.mubr.msk.f32.mxu1 %vm522_vm1, %v2302_v35  ;;  %2017 = vmatprep.subr.bf16.mxu1 %v2016_v33  ;;  %v2342_v47 = vld [vmem:[%s2478_s1] ss:$0 sm:$0xff]  ;;  %v2348_v52 = vld [vmem:[%s2478_s1 + $0x1] ss:$0 sm:$0xff]  ;;  %s2170_s12 = smov 112   ;;  %s2171_s17 = smov 48  }
 0x151   : > { %2019 = vmatpush3.bf16.msra.mxu1 %v2016_v33  ;;  %s2172_s22 = smov 16   ;;  %p1847_p5 = scmp.ne.s32.totalorder %s2235_s14, 1 }
 0x152   : > { %2021 = vmatprep.subr.bf16.mxu1 %v2020_v36  ;;  %vm1686_vm5 = vcmask (!%p1847_p5), 1041409   ;;  %vm1689_vm6 = vcmask (!%p1847_p5), 254976  }
 0x153   : > { %v2306_v37 = vld [vmem:[#allocation2 + $0x8] sm:$0xff] }
 0x155   : > { %2023 = vmatpush3.bf16.msra.mxu1 %v2020_v36 }
 0x156   : > { %1919 = vmatprep.subr.mxu1 %v2165_v38 }
 0x158   : > { %1917 = vmatmul.mubr.msk.f32.vlgmr.msra.gmra.mrb[0].mxu1 %vm522_vm1, %v2306_v37 }
 0x159   : > { %1921 = vmatprep.mubr.msk.f32.mxu1 %vm2166_vm2, %v2165_v38 }
 0x22b   : > { %v1918_v40 = vpop.f32.mrb[0].mxu1 }
 0x22c   : > { %v595_v41 = vpop.f32.mrb[1].mxu1  ;;  %v2324_v43 = vadd.f32 %v1918_v40, %v1819_v39 }
 0x22d   : > { %v2321_v42 = vadd.f32 %v1819_v39, %v595_v41 }
 0x22f   : > { %605 = vrot.lane.b32.xlu0 %v2321_v42, %s2167_s23 }
 0x233   : > { %683 = vrot.lane.b32.xlu0 %v2324_v43, %s2167_s23 }
 0x2a1   : > { %v606_v44 = vpop.permute.xlu0 %605 }
 0x2a2   : > { %1920 = vmatpush3.xpose.msk.msra.mxu1 %vm607_vm3, %v606_v44 }
 0x2a3   : > { %1924 = vmatprep.subr.mxu1 %v2165_v38 }
 0x2a5   : > { %1922 = vmatmul.mubr.msk.f32.vlgmr.msra.gmra.mrb[2].mxu1 %vm607_vm3, %v2321_v42  ;;  %v684_v45 = vpop.permute.xlu0 %683 }
 0x2a6   : > { %1925 = vmatpush3.xpose.msk.msra.mxu1 %vm607_vm3, %v684_v45  ;;  %1926 = vmatprep.mubr.msk.f32.mxu1 %vm2166_vm2, %v2165_v38 }
 0x2a7   : > { %1934 = vmatprep.subr.mxu1 %v2165_v38 }
 0x2a9   : > { %1927 = vmatmul.mubr.msk.f32.vlgmr.msra.gmra.mrb[4].mxu1 %vm607_vm3, %v2324_v43 }
 0x2aa   : > { %1936 = vmatprep.mubr.msk.f32.mxu1 %vm2166_vm2, %v2165_v38 }
 0x378   : > { %v678_v46 = vpop.f32.mrb[2].mxu1 }
 0x379   : > { %v759_v48 = vmul.f32 0.25, %v678_v46  ;;  %v1923_v49 = vpop.f32.mrb[3].mxu1 }
 0x37b   : > { %v773_v50 = vadd.f32 %v2342_v47, %v759_v48 }
 0x37c   : > { %v755_v51 = vpop.f32.mrb[4].mxu1 }
 0x37d   : > { %v760_v53 = vmul.f32 0.25, %v755_v51  ;;  %v1928_v54 = vpop.f32.mrb[5].mxu1  ;;  %v776_v55 = vsel %vm775_vm4, %v773_v50, -inf  ;;  %v1294_v51 = vld [vmem:[%s2256_s25] sm:$0xff] }
 0x37e   : > { %777 = vmax.xlane.f32.xlu1 %v776_v55  ;;  %v1297_v54 = vld [vmem:[%s2256_s25 + $0x18] sm:$0xff] }
 0x37f   : > { %v774_v56 = vadd.f32 %v2348_v52, %v760_v53 }
 0x381   : > { %v779_v57 = vsel %vm775_vm4, %v774_v56, -inf }
 0x382   : > { %780 = vmax.xlane.f32.xlu1 %v779_v57 }
 0x393   : > { %798 = vrot.lane.b32.xlu1 %v2321_v42, %s2168_s19 }
 0x397   : > { %874 = vrot.lane.b32.xlu1 %v2324_v43, %s2168_s19 }
 0x39b   : > { %952 = vrot.lane.b32.xlu1 %v2321_v42, %s2169_s30 }
 0x39f   : > { %1030 = vrot.lane.b32.xlu1 %v2324_v43, %s2169_s30 }
 0x40b   : > { %v778_v58 = vpop.xlane.xlu1 %777 }
 0x40c   : > { %v782_v59 = vsub.f32 %v773_v50, %v778_v58 }
 0x40e   : > { %v784_v60 = vmul.f32 1.442695, %v782_v59 }
 0x40f   : > { %v781_v61 = vpop.xlane.xlu1 %780 }
 0x410   : > { %2099 = vpow2.f32 %v784_v60  ;;  %v783_v62 = vsub.f32 %v774_v56, %v781_v61 }
 0x412   : > { %v786_v63 = vmul.f32 1.442695, %v783_v62 }
 0x413   : > { %v799_v0 = vpop.permute.xlu1 %798 }
 0x414   : > { %2101 = vpow2.f32 %v786_v63  ;;  %1930 = vmatpush3.msra.mxu0 %v799_v0  ;;  %v1836_v0 = vld [vmem:[%s2277_s24] ss:$0 sm:$0xff] }
 0x415   : > { %1939 = vmatprep.subr.mxu0 %v2165_v38 }
 0x417   : > { %v875_v1 = vpop.permute.xlu1 %874 }
 0x418   : > { %1935 = vmatpush3.msra.mxu1 %v875_v1 }
 0x419   : > { %1944 = vmatprep.subr.mxu1 %v2165_v38 }
 0x41a   : > { %v2100_v2 = vpop.eup %2099 }
 0x41b   : > { %v788_v3 = vsel %vm775_vm4, %v2100_v2, 0.0  ;;  %v953_v6 = vpop.permute.xlu1 %952 }
 0x41c   : > { %789 = vadd.xlane.f32.xlu0 %v788_v3 }
 0x41e   : > { %v2102_v4 = vpop.eup %2101 }
 0x41f   : > { %v791_v5 = vsel %vm775_vm4, %v2102_v4, 0.0  ;;  %v1031_v7 = vpop.permute.xlu1 %1030 }
 0x420   : > { %792 = vadd.xlane.f32.xlu1 %v791_v5 }
 0x431   : > { %1028 = vrot.lane.b32.xlu1 %v2324_v43, %s2170_s12 }
 0x432   : > { %950 = vrot.lane.b32.xlu0 %v2321_v42, %s2170_s12 }
 0x4a9   : > { %v790_v8 = vpop.xlane.xlu0 %789 }
 0x4aa   : > { %2103 = vrcp.f32 %v790_v8 }
 0x4ad   : > { %v793_v9 = vpop.xlane.xlu1 %792  ;;  %v951_v14 = vpop.permute.xlu0 %950 }
 0x4ae   : > { %2105 = vrcp.f32 %v793_v9 }
 0x4b1   : > { %v1029_v15 = vpop.permute.xlu1 %1028 }
 0x4b4   : > { %v2104_v10 = vpop.eup %2103 }
 0x4b5   : > { %v796_v11 = vmul.f32 %v2104_v10, %v2100_v2 }
 0x4b7   : > { %1932 = vmatmul.mubr.msk.f32.vlgmr.msra.gmra.mrb[0].mxu0 %vm775_vm4, %v796_v11 }
 0x4b8   : > { %v2106_v12 = vpop.eup %2105  ;;  %1940 = vmatpush3.xpose.msk.msra.mxu0 %vm607_vm3, %v953_v6  ;;  %1941 = vmatprep.mubr.msk.f32.mxu0 %vm2166_vm2, %v2165_v38 }
 0x4b9   : > { %v797_v13 = vmul.f32 %v2106_v12, %v2102_v4  ;;  %1949 = vmatprep.subr.mxu0 %v2165_v38 }
 0x4bb   : > { %1937 = vmatmul.mubr.msk.f32.vlgmr.msra.gmra.mrb[6].mxu1 %vm775_vm4, %v797_v13  ;;  %1942 = vmatmul.mubr.msk.f32.vlgmr.msra.gmra.mrb[2].mxu0 %vm607_vm3, %v951_v14 }
 0x4bc   : > { %1945 = vmatpush3.xpose.msk.msra.mxu1 %vm607_vm3, %v1031_v7  ;;  %1946 = vmatprep.mubr.msk.f32.mxu1 %vm2166_vm2, %v2165_v38 }
 0x4bd   : > { %1954 = vmatprep.subr.mxu1 %v2165_v38  ;;  %1951 = vmatprep.mubr.msk.f32.mxu0 %vm2166_vm2, %v2165_v38 }
 0x4bf   : > { %1947 = vmatmul.mubr.msk.f32.vlgmr.msra.gmra.mrb[8].mxu1 %vm607_vm3, %v1029_v15 }
 0x4c0   : > { %1956 = vmatprep.mubr.msk.f32.mxu1 %vm2166_vm2, %v2165_v38 }
 0x58a   : > { %v2379_v16 = vpop.f32.mrb[0].mxu0 }
 0x58b   : > { %v1933_v17 = vpop.f32.mrb[1].mxu0 }
 0x58c   : > { %v1424_v17 = vld [vmem:[%s2261_s28] sm:$0xff] }
 0x58e   : > { %v2381_v18 = vpop.f32.mrb[6].mxu1  ;;  %v1024_v19 = vpop.f32.mrb[2].mxu0 }
 0x58f   : > { %v1106_v20 = vmul.f32 0.25, %v1024_v19  ;;  %v1938_v21 = vpop.f32.mrb[7].mxu1  ;;  %v1943_v22 = vpop.f32.mrb[3].mxu0 }
 0x590   : > { %v1427_v21 = vld [vmem:[%s2261_s28 + $0x18] sm:$0xff] }
 0x591   : > { %v1108_v23 = vadd.f32 %v2342_v47, %v1106_v20  ;;  %v1426_v20 = vld [vmem:[%s2261_s28 + $0x10] sm:$0xff] }
 0x592   : > { %v1102_v24 = vpop.f32.mrb[8].mxu1  ;;  %v2036_v22 = vpack.c.bf16 %v1427_v21, %v1426_v20 }
 0x593   : > { %v1107_v25 = vmul.f32 0.25, %v1102_v24  ;;  %v1948_v26 = vpop.f32.mrb[9].mxu1  ;;  %v1110_v27 = vsel %vm775_vm4, %v1108_v23, -inf  ;;  %v1527_v24 = vld [vmem:[%s2272_s21 + $0x8] sm:$0xff] }
 0x594   : > { %1111 = vmax.xlane.f32.xlu1 %v1110_v27  ;;  %v1529_v27 = vld [vmem:[%s2272_s21 + $0x18] sm:$0xff] }
 0x595   : > { %v1109_v28 = vadd.f32 %v2348_v52, %v1107_v25  ;;  %v1295_v52 = vld [vmem:[%s2256_s25 + $0x8] sm:$0xff]  ;;  %v1528_v25 = vld [vmem:[%s2272_s21 + $0x10] sm:$0xff] }
 0x596   : > { %v2024_v53 = vpack.c.bf16 %v1295_v52, %v1294_v51  ;;  %v1532_v51 = vld [vmem:[%s2272_s21 + $0x30] sm:$0xff]  ;;  %v1533_v52 = vld [vmem:[%s2272_s21 + $0x38] sm:$0xff] }
 0x597   : > { %v1113_v29 = vsel %vm775_vm4, %v1109_v28, -inf }
 0x598   : > { %1114 = vmax.xlane.f32.xlu0 %v1113_v29  ;;  %v1530_v29 = vld [vmem:[%s2272_s21 + $0x20] sm:$0xff] }
 0x5ae   : > { %1208 = vrot.lane.b32.xlu0 %v2324_v43, %s2171_s17 }
 0x621   : > { %v1112_v30 = vpop.xlane.xlu1 %1111 }
 0x622   : > { %v1116_v31 = vsub.f32 %v1108_v23, %v1112_v30  ;;  %v1526_v23 = vld [vmem:[%s2272_s21] sm:$0xff]  ;;  %v1531_v30 = vld [vmem:[%s2272_s21 + $0x28] sm:$0xff] }
 0x623   : > { %v2040_v26 = vpack.c.bf16 %v1527_v24, %v1526_v23 }
 0x624   : > { %v1118_v32 = vmul.f32 1.442695, %v1116_v31  ;;  %v2048_v31 = vpack.c.bf16 %v1531_v30, %v1530_v29 }
 0x625   : > { %v1115_v33 = vpop.xlane.xlu0 %1114 }
 0x626   : > { %2107 = vpow2.f32 %v1118_v32  ;;  %v1117_v34 = vsub.f32 %v1109_v28, %v1115_v33  ;;  %v2044_v28 = vpack.c.bf16 %v1529_v27, %v1528_v25 }
 0x628   : > { %v1120_v36 = vmul.f32 1.442695, %v1117_v34 }
 0x629   : > { %v1209_v38 = vpop.permute.xlu0 %1208 }
 0x62a   : > { %2109 = vpow2.f32 %v1120_v36  ;;  %1955 = vmatpush3.msra.mxu1 %v1209_v38 }
 0x62b   : > { %2025 = vmatprep.subr.bf16.mxu1 %v2024_v53 }
 0x630   : > { %v2108_v39 = vpop.eup %2107 }
 0x631   : > { %v1122_v40 = vsel %vm775_vm4, %v2108_v39, 0.0 }
 0x632   : > { %1123 = vadd.xlane.f32.xlu1 %v1122_v40 }
 0x634   : > { %v2110_v41 = vpop.eup %2109 }
 0x635   : > { %v1125_v44 = vsel %vm775_vm4, %v2110_v41, 0.0 }
 0x636   : > { %1126 = vadd.xlane.f32.xlu1 %v1125_v44 }
 0x647   : > { %1132 = vrot.lane.b32.xlu1 %v2321_v42, %s2171_s17  ;;  %v1296_v42 = vld [vmem:[%s2256_s25 + $0x10] sm:$0xff] }
 0x648   : > { %v2028_v55 = vpack.c.bf16 %v1297_v54, %v1296_v42  ;;  %v1534_v42 = vld [vmem:[%s2272_s21 + $0x40] sm:$0xff]  ;;  %v1535_v54 = vld [vmem:[%s2272_s21 + $0x48] sm:$0xff] }
 0x6bf   : > { %v1124_v43 = vpop.xlane.xlu1 %1123 }
 0x6c0   : > { %2111 = vrcp.f32 %v1124_v43  ;;  %v1840_v43 = vld [vmem:[%s2277_s24 + $0x2] ss:$0 sm:$0xff] }
 0x6c3   : > { %v1127_v45 = vpop.xlane.xlu1 %1126 }
 0x6c4   : > { %2113 = vrcp.f32 %v1127_v45 }
 0x6c7   : > { %v1133_v46 = vpop.permute.xlu1 %1132 }
 0x6c8   : > { %1950 = vmatpush3.msra.mxu0 %v1133_v46 }
 0x6c9   : > { %2041 = vmatprep.subr.bf16.mxu0 %v2040_v26 }
 0x6ca   : > { %v2112_v47 = vpop.eup %2111 }
 0x6cb   : > { %v1130_v48 = vmul.f32 %v2112_v47, %v2108_v39 }
 0x6cd   : > { %1952 = vmatmul.mubr.msk.f32.vlgmr.msra.gmra.mrb[4].mxu0 %vm775_vm4, %v1130_v48 }
 0x6ce   : > { %v2114_v49 = vpop.eup %2113  ;;  %2043 = vmatpush3.bf16.msra.mxu0 %v2040_v26 }
 0x6cf   : > { %v1131_v50 = vmul.f32 %v2114_v49, %v2110_v41  ;;  %2045 = vmatprep.subr.bf16.mxu0 %v2044_v28  ;;  %v1839_v41 = vld [vmem:[%s2277_s24 + $0x1] ss:$0 sm:$0xff] }
 0x6d1   : > { %1957 = vmatmul.mubr.msk.f32.vlgmr.msra.gmra.mrb[10].mxu1 %vm775_vm4, %v1131_v50 }
 0x6d2   : > { %2027 = vmatpush3.bf16.msra.mxu1 %v2024_v53  ;;  %2047 = vmatpush3.bf16.msra.mxu0 %v2044_v28  ;;  %v2052_v53 = vpack.c.bf16 %v1533_v52, %v1532_v51 }
 0x6d3   : > { %2029 = vmatprep.subr.bf16.mxu1 %v2028_v55  ;;  %2049 = vmatprep.subr.bf16.mxu0 %v2048_v31 }
 0x6d6   : > { %2031 = vmatpush3.bf16.msra.mxu1 %v2028_v55  ;;  %2051 = vmatpush3.bf16.msra.mxu0 %v2048_v31  ;;  %v2056_v55 = vpack.c.bf16 %v1535_v54, %v1534_v42 }
 0x6d7   : > { %2053 = vmatprep.subr.bf16.mxu0 %v2052_v53 }
 0x6da   : > { %2055 = vmatpush3.bf16.msra.mxu0 %v2052_v53 }
 0x6db   : > { %2057 = vmatprep.subr.bf16.mxu0 %v2056_v55 }
 0x6de   : > { %2059 = vmatpush3.bf16.msra.mxu0 %v2056_v55 }
 0x7a0   : > { %v1204_v56 = vpop.f32.mrb[4].mxu0 }
 0x7a1   : > { %1286 = vrot.lane.b32.xlu1 %v1204_v56, %s2172_s22  ;;  %v1953_v57 = vpop.f32.mrb[5].mxu0  ;;  %v1536_v56 = vld [vmem:[%s2272_s21 + $0x50] sm:$0xff] }
 0x7a2   : > { %v1537_v57 = vld [vmem:[%s2272_s21 + $0x58] sm:$0xff] }
 0x7a4   : > { %v1280_v58 = vpop.f32.mrb[10].mxu1 }
 0x7a5   : > { %1288 = vrot.lane.b32.xlu1 %v1280_v58, %s2172_s22  ;;  %v1958_v59 = vpop.f32.mrb[11].mxu1  ;;  %v2060_v58 = vpack.c.bf16 %v1537_v57, %v1536_v56 }
 0x7a6   : > { %v1538_v59 = vld [vmem:[%s2272_s21 + $0x60] sm:$0xff] }
 0x7a7   : > { %2061 = vmatprep.subr.bf16.mxu0 %v2060_v58 }
 0x7a8   : > { %2063 = vmatpush3.bf16.msra.mxu0 %v2060_v58 }
 0x813   : > { %v1287_v60 = vpop.permute.xlu1 %1286 }
 0x814   : > { %v1292_v61 = vsel %vm607_vm3, %v2379_v16, %v1287_v60  ;;  %v1539_v60 = vld [vmem:[%s2272_s21 + $0x68] sm:$0xff] }
 0x815   : > { %1967 = vmatprep.mubr.msk.f32.mxu1 %vm522_vm1, %v1292_v61  ;;  %v2064_v61 = vpack.c.bf16 %v1539_v60, %v1538_v59 }
 0x817   : > { %v1289_v62 = vpop.permute.xlu1 %1288  ;;  %2065 = vmatprep.subr.bf16.mxu0 %v2064_v61 }
 0x818   : > { %v1293_v63 = vsel %vm607_vm3, %v2381_v18, %v1289_v62  ;;  %v1425_v18 = vld [vmem:[%s2261_s28 + $0x8] sm:$0xff]  ;;  %2067 = vmatpush3.bf16.msra.mxu0 %v2064_v61  ;;  %v1540_v62 = vld [vmem:[%s2272_s21 + $0x70] sm:$0xff] }
 0x819   : > { %1968 = vmatmul.mubr.msk.f32.vlgmr.msra.gmra.mrb[12].mxu1 %vm522_vm1, %v1293_v63  ;;  %v2032_v19 = vpack.c.bf16 %v1425_v18, %v1424_v17  ;;  %v1541_v63 = vld [vmem:[%s2272_s21 + $0x78] sm:$0xff] }
 0x81b   : > { %2033 = vmatprep.subr.bf16.mxu1 %v2032_v19 }
 0x81c   : > { %2035 = vmatpush3.bf16.msra.mxu1 %v2032_v19 }
 0x81d   : > { %2037 = vmatprep.subr.bf16.mxu1 %v2036_v22 }
 0x820   : > { %2039 = vmatpush3.bf16.msra.mxu1 %v2036_v22 }
 0x8ec   : > { %v1969_v1 = vpop.f32.mrb[12].mxu1 }
 0x8ed   : > { %v1380_v2 = vadd.f32 %v1969_v1, %v1836_v0  ;;  %v1374_v3 = vpop.f32.mrb[13].mxu1  ;;  %v1841_v1 = vld [vmem:[%s441_s11] ss:$0 sm:$0xff] }
 0x8ee   : > { %v1375_v4 = vadd.f32 %v1836_v0, %v1374_v3  ;;  %v2068_v0 = vpack.c.bf16 %v1541_v63, %v1540_v62 }
 0x8ef   : > { %v1384_v5 = vadd.f32 %v1380_v2, %v2306_v37 }
 0x8f0   : > { %v1383_v6 = vadd.f32 %v1375_v4, %v2302_v35  ;;  %2069 = vmatprep.subr.bf16.mxu0 %v2068_v0 }
 0x8f1   : > { %v1388_v7 = vsel %vm522_vm1, %v1384_v5, 0.0  ;;  %2071 = vmatpush3.bf16.msra.mxu0 %v2068_v0 }
 0x8f2   : > { %1389 = vadd.xlane.f32.xlu1 %v1388_v7  ;;  %v1385_v8 = vsel %vm522_vm1, %v1383_v6, 0.0 }
 0x8f3   : > { %1386 = vadd.xlane.f32.xlu0 %v1385_v8 }
 0x97f   : > { %v1390_v9 = vpop.xlane.xlu1 %1389 }
 0x980   : > { %v1393_v10 = vmul.f32 0.03125, %v1390_v9  ;;  %v1387_v11 = vpop.xlane.xlu0 %1386 }
 0x981   : > { %v1392_v12 = vmul.f32 0.03125, %v1387_v11 }
 0x982   : > { %v1395_v13 = vsub.f32 %v1384_v5, %v1393_v10 }
 0x983   : > { %v1394_v14 = vsub.f32 %v1383_v6, %v1392_v12 }
 0x984   : > { %v1397_v37 = vmul.f32 %v1395_v13, %v1395_v13 }
 0x985   : > { %v1396_v15 = vmul.f32 %v1394_v14, %v1394_v14 }
 0x986   : > { %v1401_v16 = vsel %vm522_vm1, %v1397_v37, 0.0 }
 0x987   : > { %v1398_v35 = vsel %vm522_vm1, %v1396_v15, 0.0 }
 0x988   : > { %1399 = vadd.xlane.f32.xlu0 %v1398_v35  ;;  %v1844_v35 = vld [vmem:[%s2277_s24 + $0x3] ss:$0 sm:$0xff] }
 0x98c   : > { %1402 = vadd.xlane.f32.xlu0 %v1401_v16 }
 0xa15   : > { %v1400_v32 = vpop.xlane.xlu0 %1399 }
 0xa16   : > { %v1404_v33 = vmul.f32 0.03125, %v1400_v32 }
 0xa18   : > { %v1406_v34 = vadd.f32 1e-12, %v1404_v33 }
 0xa19   : > { %v1403_v36 = vpop.xlane.xlu0 %1402 }
 0xa1a   : > { %2115 = vrsqrt.f32 %v1406_v34  ;;  %v1405_v38 = vmul.f32 0.03125, %v1403_v36 }
 0xa1c   : > { %v1407_v39 = vadd.f32 1e-12, %v1405_v38 }
 0xa1e   : > { %2117 = vrsqrt.f32 %v1407_v39 }
 0xa24   : > { %v2116_v40 = vpop.eup %2115 }
 0xa25   : > { %v1410_v44 = vmul.f32 %v2116_v40, %v1394_v14 }
 0xa27   : > { %v1416_v45 = vmul.f32 %v1839_v41, %v1410_v44  ;;  %v1845_v44 = vld [vmem:[%s2277_s24 + $0x4] ss:$0 sm:$0xff] }
 0xa28   : > { %v2118_v46 = vpop.eup %2117 }
 0xa29   : > { %v1411_v47 = vmul.f32 %v2118_v46, %v1395_v13  ;;  %v1422_v48 = vadd.f32 %v1840_v43, %v1416_v45  ;;  %v1846_v46 = vld [vmem:[%s2277_s24 + $0x5] ss:$0 sm:$0xff] }
 0xa2b   : > { %v1417_v49 = vmul.f32 %v1839_v41, %v1411_v47  ;;  %1978 = vmatprep.mubr.msk.f32.mxu1 %vm522_vm1, %v1422_v48 }
 0xa2d   : > { %v1423_v50 = vadd.f32 %v1840_v43, %v1417_v49 }
 0xa2f   : > { %1979 = vmatmul.mubr.msk.f32.vlgmr.msra.gmra.mrb[14].mxu1 %vm522_vm1, %v1423_v50 }
 0xb02   : > { %v1980_v2 = vpop.f32.mrb[14].mxu1 }
 0xb03   : > { %v1513_v3 = vadd.f32 %v1980_v2, %v1841_v1  ;;  %v1507_v4 = vpop.f32.mrb[15].mxu1 }
 0xb04   : > { %v1508_v5 = vadd.f32 %v1841_v1, %v1507_v4 }
 0xb05   : > { %v1519_v6 = vmul.f32 0.70710677, %v1513_v3  ;;  %v1517_v13 = vmul.f32 0.5, %v1513_v3 }
 0xb06   : > { %v1518_v7 = vmul.f32 0.70710677, %v1508_v5  ;;  %v1516_v11 = vmul.f32 0.5, %v1508_v5 }
 0xb07   : > { %2119 = verf.f32 %v1519_v6 }
 0xb08   : > { %2121 = verf.f32 %v1518_v7 }
 0xb11   : > { %v2120_v8 = vpop.eup %2119 }
 0xb12   : > { %v2122_v9 = vpop.eup %2121  ;;  %v1523_v10 = vadd.f32 1.0, %v2120_v8 }
 0xb13   : > { %v1522_v12 = vadd.f32 1.0, %v2122_v9 }
 0xb14   : > { %v1525_v15 = vmul.f32 %v1523_v10, %v1517_v13 }
 0xb15   : > { %v1524_v14 = vmul.f32 %v1522_v12, %v1516_v11 }
 0xb17   : > { %2013 = vmatprep.mubr.f32.mxu0 %v1524_v14 }
 0xb18   : > { %2014 = vmatmul.mubr.f32.vlgmr.msra.gmra.mrb[6].mxu0 %v1525_v15 }
 0xbeb   : > { %v2015_v37 = vpop.f32.mrb[6].mxu0 }
 0xbec   : > { %v1618_v16 = vadd.f32 %v2015_v37, %v1844_v35  ;;  %v1612_v17 = vpop.f32.mrb[7].mxu0 }
 0xbed   : > { %v1613_v18 = vadd.f32 %v1844_v35, %v1612_v17 }
 0xbee   : > { %v1622_v19 = vadd.f32 %v1618_v16, %v1423_v50 }
 0xbef   : > { %v1621_v20 = vadd.f32 %v1613_v18, %v1422_v48 }
 0xbf0   : > { %v1626_v21 = vsel %vm522_vm1, %v1622_v19, 0.0 }
 0xbf1   : > { %1627 = vadd.xlane.f32.xlu0 %v1626_v21  ;;  %v1623_v22 = vsel %vm522_vm1, %v1621_v20, 0.0 }
 0xbf2   : > { %1624 = vadd.xlane.f32.xlu1 %v1623_v22 }
 0xc7e   : > { %v1628_v23 = vpop.xlane.xlu0 %1627 }
 0xc7f   : > { %v1630_v24 = vmul.f32 0.03125, %v1628_v23  ;;  %v1625_v25 = vpop.xlane.xlu1 %1624 }
 0xc80   : > { %v1629_v26 = vmul.f32 0.03125, %v1625_v25 }
 0xc81   : > { %v1632_v27 = vsub.f32 %v1622_v19, %v1630_v24 }
 0xc82   : > { %v1631_v28 = vsub.f32 %v1621_v20, %v1629_v26 }
 0xc83   : > { %v1634_v29 = vmul.f32 %v1632_v27, %v1632_v27 }
 0xc84   : > { %v1633_v30 = vmul.f32 %v1631_v28, %v1631_v28 }
 0xc85   : > { %v1638_v31 = vsel %vm522_vm1, %v1634_v29, 0.0 }
 0xc86   : > { %1639 = vadd.xlane.f32.xlu0 %v1638_v31  ;;  %v1635_v32 = vsel %vm522_vm1, %v1633_v30, 0.0 }
 0xc87   : > { %1636 = vadd.xlane.f32.xlu1 %v1635_v32 }
 0xd13   : > { %v1640_v33 = vpop.xlane.xlu0 %1639 }
 0xd14   : > { %v1642_v34 = vmul.f32 0.03125, %v1640_v33  ;;  %v1637_v36 = vpop.xlane.xlu1 %1636 }
 0xd15   : > { %v1641_v38 = vmul.f32 0.03125, %v1637_v36 }
 0xd16   : > { %v1644_v39 = vadd.f32 1e-12, %v1642_v34 }
 0xd17   : > { %v1643_v40 = vadd.f32 1e-12, %v1641_v38 }
 0xd18   : > { %2123 = vrsqrt.f32 %v1644_v39 }
 0xd19   : > { %2125 = vrsqrt.f32 %v1643_v40 }
 0xd22   : > { %v2124_v41 = vpop.eup %2123 }
 0xd23   : > { %v2126_v43 = vpop.eup %2125  ;;  %v1648_v45 = vmul.f32 %v2124_v41, %v1632_v27 }
 0xd24   : > { %v1647_v47 = vmul.f32 %v2126_v43, %v1631_v28  ;;  %1666 = sbr.rel (%p1847_p5) target bundleno = 3387 (0xd3b), region = 68 }
 0xd25   : > { %v1654_v48 = vmul.f32 %v1845_v44, %v1648_v45 }
 0xd26   : > { %v1653_v49 = vmul.f32 %v1845_v44, %v1647_v47 }
 0xd27   : > { %v1660_v50 = vadd.f32 %v1846_v46, %v1654_v48 }
 0xd28   : > { %v1659_v51 = vadd.f32 %v1846_v46, %v1653_v49 }
 0xd29   : > { %1662 = vst.msk [vmem:[#allocation2 + $0x8] sm:$0xff] %vm522_vm1, %v1660_v50  ;;  %v1674_v53 = vsel (!%p1847_p5), %vm522_vm1, %v1660_v50, 0.0 }
 0xd2a   : > { %1661 = vst.msk [vmem:[#allocation2] sm:$0xff] %vm522_vm1, %v1659_v51  ;;  %v1667_v52 = vsel (!%p1847_p5), %vm522_vm1, %v1659_v51, 0.0  ;;  %v1675_v54 = vrot.slane (!%p1847_p5), %v1674_v53, 4 }
 0xd2b   : > { %v1668_v42 = vrot.slane %v1667_v52, 4 }
 0xd2c   : > { %v1676_v56 = vadd.f32 %v1675_v54, %v1674_v53 }
 0xd2d   : > { %v1669_v55 = vadd.f32 %v1668_v42, %v1667_v52 }
 0xd2e   : > { %v1677_v58 = vrot.slane %v1676_v56, 2 }
 0xd2f   : > { %v1670_v57 = vrot.slane %v1669_v55, 2 }
 0xd30   : > { %v1678_v60 = vadd.f32 %v1677_v58, %v1676_v56 }
 0xd31   : > { %v1671_v59 = vadd.f32 %v1670_v57, %v1669_v55 }
 0xd32   : > { %v1679_v62 = vrot.slane %v1678_v60, 1 }
 0xd33   : > { %v1672_v61 = vrot.slane %v1671_v59, 1 }
 0xd34   : > { %v1680_v0 = vadd.f32 %v1679_v62, %v1678_v60 }
 0xd35   : > { %v1673_v63 = vadd.f32 %v1672_v61, %v1671_v59 }
 0xd36   : > { %v1683_v2 = vmul.f32 0.125, %v1680_v0 }
 0xd37   : > { %v1682_v1 = vmul.f32 0.125, %v1673_v63 }
 0xd39   : > { %v1687_v3 = vsel %vm1686_vm5, %v1683_v2, %v1682_v1 }
 0xd3a   : > { %1690 = vst.msk [vmem:[#allocation3] sm:$0x3] %vm1689_vm6, %v1687_v3 }
 0xd3b PF: > { %p2076_p6 = scmp.eq.s32.totalorder %s2235_s14, 1  ;;  %s2173_s15 = smov [#allocation3]  }
 0xd3c   : > { %s1698_s11 = sshll.u32 %s2173_s15, 4  ;;  %s1699_s11 = int_to_ptr.vmem [resolvable:$true] %s1698_s11 }
 0xd3d   : > { %s2127_s21 = scalar_lea.vmem %s1699_s11, 32  ;;  %p2134_p10 = scmp.lt.s32.totalorder %s1699_s11, %s1699_s11 }
 0xd3e   : > { %p2128_p7 = scmp.ne.s32.totalorder %s1699_s11, %s2127_s21  ;;  %p2135_p11 = scmp.lt.s32.totalorder %s2127_s21, %s2127_s21 }
 0xd40   : > { %p2129_p8 = pnand %p2128_p7, %p2076_p6  ;;  %p2136_p12 = por %p2135_p11, %p2134_p10 }
 0xd42   : > { %p2130_p9 = pneg %p2129_p8 }
 0xd44   : > { %p2137_p13 = pnand %p2136_p12, %p2130_p9 }
 0xd46   : > { %2140 = shalt.err (!%p2137_p13)
}
 0xd47   : > { %s2141_s20 = scalar_lea.hbm %s2487_s10, 32 }
 0xd48   : > { %p2142_p0 = scmp.ne.s32.totalorder %s2487_s10, %s2141_s20  ;;  %p2147_p3 = scmp.lt.u32.totalorder %s2141_s20, %s2487_s10 }
 0xd4a   : > { %p2143_p1 = pnand %p2142_p0, %p2076_p6 }
 0xd4c   : > { %p2144_p2 = pneg %p2143_p1 }
 0xd4e   : > { %p2149_p4 = pnand %p2147_p3, %p2144_p2 }
 0xd50   : > { %2152 = shalt.err (!%p2149_p4)
}
 0xd51   : > { %2073 = dma.vmem_to_hbm [thread:$0]  (%p2076_p6), %s1699_s11, 32, %s2487_s10, [#allocation4]  }
 0xd52   : > { %2158 = dma.done.wait (%p2076_p6), [#allocation4], 32  }
 0xd53   : > { %2160 = vsyncadd (%p2076_p6), [#allocation4], 4294967264 }
 0xd54 PF: > { %s21_s13 = sadd.s32 1, %s2163_s13  }
 0xd55   : > { %p18_p5 = scmp.ge.s32.totalorder %s21_s13, 4  }
 0xd57   :  { %20 = sbr.rel (!%p18_p5) target bundleno = 1 (0x1), region = 113 }
 0xd5e   :  { %1711 = vsyncpa [#allocation4], 1 }
 0xd5f   :  { %1713 = vsyncpa [#allocation4 + $0x1], 1 }

</bundles_post_ra>
